<compile_context>
chip_gen: v5e
topology: v5e:2x2
jax: 0.10.0
libtpu: 0.0.40
codegen_flags: <defaults>
</compile_context>

<pallas_src>
import jax
import jax.numpy as jnp
import numpy as np
from jax.experimental import pallas as pl
from jax.experimental.pallas import tpu as pltpu


# ----------------------------- tiling helpers ---------------------------------

def _sublane_tile(dim, target):
    """Tile for a second-minor (sublane) axis: target if it divides dim and is a
    multiple of 8, otherwise fall back to the full dimension."""
    if dim % target == 0 and target % 8 == 0:
        return target
    return dim


def _lane_tile(dim, target):
    """Tile for a minor (lane) axis: target if it divides dim and is a multiple
    of 128, otherwise fall back to the full dimension."""
    if dim % target == 0 and target % 128 == 0:
        return target
    return dim


# --------------------------- tiled linear (fused QKV) --------------------------

def _linear_kernel(x_ref, w_ref, b_ref, o_ref, acc_ref):
    # Grid = (M/tm, N/tn, K/tk); K is the innermost reduction axis.
    @pl.when(pl.program_id(2) == 0)
    def _init():
        acc_ref[...] = jnp.zeros_like(acc_ref)

    acc_ref[...] += jnp.dot(x_ref[...], w_ref[...],
                            preferred_element_type=jnp.float32)

    @pl.when(pl.program_id(2) == pl.num_programs(2) - 1)
    def _finalize():
        o_ref[...] = (acc_ref[...] + b_ref[...]).astype(o_ref.dtype)


def pallas_linear(x, w, b, *, out_dtype, tm=256, tn=256, tk=512):
    """y = x @ w + b, tiled matmul with f32 accumulation on the MXU."""
    M, K = x.shape
    K2, N = w.shape
    assert K == K2
    tm = _sublane_tile(M, tm)
    tn = _lane_tile(N, tn)
    tk = _lane_tile(K, tk)
    grid = (M // tm, N // tn, K // tk)

    itemsize = jnp.dtype(x.dtype).itemsize
    cost = pl.CostEstimate(
        flops=2 * M * K * N,
        transcendentals=0,
        bytes_accessed=(M * K + K * N) * itemsize
        + M * N * jnp.dtype(out_dtype).itemsize + N * 4)

    return pl.pallas_call(
        _linear_kernel,
        out_shape=jax.ShapeDtypeStruct((M, N), out_dtype),
        grid_spec=pltpu.PrefetchScalarGridSpec(
            num_scalar_prefetch=0,
            grid=grid,
            in_specs=[
                pl.BlockSpec((tm, tk), lambda i, j, k: (i, k)),
                pl.BlockSpec((tk, tn), lambda i, j, k: (k, j)),
                pl.BlockSpec((1, tn), lambda i, j, k: (0, j)),
            ],
            out_specs=pl.BlockSpec((tm, tn), lambda i, j, k: (i, j)),
            scratch_shapes=[pltpu.VMEM((tm, tn), jnp.float32)]),
        compiler_params=pltpu.CompilerParams(
            dimension_semantics=("parallel", "parallel", "arbitrary")),
        cost_estimate=cost,
    )(x, w, b.astype(jnp.float32).reshape(1, N))


# ------------------------- flash attention (all heads) -------------------------

def _make_flash_attention_kernel(scale, num_heads, head_dim, compute_dtype):
    # Reciprocal on the EUP (approx) for the low-precision path; exact divide-free
    # reciprocal kept for the strict f32 correctness path.
    approx_recip = (jnp.dtype(compute_dtype) != jnp.dtype(jnp.float32))

    def kernel(q_ref, k_ref, v_ref, o_ref, m_sc, l_sc, acc_sc):
        ki = pl.program_id(2)

        @pl.when(ki == 0)
        def _init():
            m_sc[...] = jnp.full(m_sc.shape, -jnp.inf, dtype=m_sc.dtype)
            l_sc[...] = jnp.zeros(l_sc.shape, dtype=l_sc.dtype)
            acc_sc[...] = jnp.zeros(acc_sc.shape, dtype=acc_sc.dtype)

        q = q_ref[0]   # (tq, E)   all heads, lane-dense
        k = k_ref[0]   # (tkv, E)
        v = v_ref[0]   # (tkv, E)

        for h in range(num_heads):            # static unroll over heads
            sl = slice(h * head_dim, (h + 1) * head_dim)
            q_h = (q[:, sl] * scale).astype(compute_dtype)   # scale folded into Q
            k_h = k[:, sl].astype(compute_dtype)
            v_h = v[:, sl].astype(compute_dtype)

            # s = q_h @ k_h^T, contracting over head_dim, f32 accumulation.
            s = jax.lax.dot_general(
                q_h, k_h, (((1,), (1,)), ((), ())),
                preferred_element_type=jnp.float32)           # (tq, tkv)

            m_prev = m_sc[h]                                   # (tq, 1)
            m_new = jnp.maximum(m_prev, s.max(axis=-1, keepdims=True))
            alpha = jnp.exp(m_prev - m_new)
            p = jnp.exp(s - m_new)
            l_sc[h] = alpha * l_sc[h] + p.sum(axis=-1, keepdims=True)
            acc_sc[:, sl] = alpha * acc_sc[:, sl] + jnp.dot(
                p.astype(compute_dtype), v_h,
                preferred_element_type=jnp.float32)
            m_sc[h] = m_new

        @pl.when(ki == pl.num_programs(2) - 1)
        def _finalize():
            for h in range(num_heads):
                sl = slice(h * head_dim, (h + 1) * head_dim)
                inv_l = pl.reciprocal(l_sc[h], approx=approx_recip)
                acc_sc[:, sl] = acc_sc[:, sl] * inv_l
            # Single lane-dense (tq, E) store of all heads.
            o_ref[0] = acc_sc[...].astype(o_ref.dtype)

    return kernel


def pallas_flash_attention(q, k, v, *, num_heads, scale, compute_dtype,
                           tq=128, tkv=256):
    """q, k, v: (B, S, E) with heads packed along E -> out (B, S, E)."""
    B, S, E = q.shape
    head_dim = E // num_heads
    tq = _sublane_tile(S, tq)
    tkv = _sublane_tile(S, tkv)
    grid = (B, S // tq, S // tkv)

    q_spec = pl.BlockSpec((1, tq, E), lambda b, qi, ki: (b, qi, 0))
    kv_spec = pl.BlockSpec((1, tkv, E), lambda b, qi, ki: (b, ki, 0))
    out_spec = pl.BlockSpec((1, tq, E), lambda b, qi, ki: (b, qi, 0))

    itemsize = jnp.dtype(q.dtype).itemsize
    cost = pl.CostEstimate(
        flops=4 * B * S * S * E,                 # QK^T and PV matmuls
        transcendentals=B * num_heads * S * S,   # exp
        bytes_accessed=4 * B * S * E * itemsize)

    return pl.pallas_call(
        _make_flash_attention_kernel(scale, num_heads, head_dim, compute_dtype),
        out_shape=jax.ShapeDtypeStruct((B, S, E), compute_dtype),
        grid_spec=pltpu.PrefetchScalarGridSpec(
            num_scalar_prefetch=0,
            grid=grid,
            in_specs=[q_spec, kv_spec, kv_spec],
            out_specs=out_spec,
            scratch_shapes=[
                pltpu.VMEM((num_heads, tq, 1), jnp.float32),  # running max m
                pltpu.VMEM((num_heads, tq, 1), jnp.float32),  # running sum l
                pltpu.VMEM((tq, E), jnp.float32),             # output accumulator
            ]),
        compiler_params=pltpu.CompilerParams(
            dimension_semantics=("parallel", "parallel", "arbitrary")),
        cost_estimate=cost,
    )(q, k, v)


# ------------------------------ module wrapper ---------------------------------

def init_params(key, embed_dim):
    """Deterministic init mimicking nn.Linear default (uniform +-1/sqrt(fan_in))."""
    bound = 1.0 / np.sqrt(embed_dim)
    keys = jax.random.split(key, 8)

    def lin(kw, kb):
        w = jax.random.uniform(kw, (embed_dim, embed_dim), jnp.float32, -bound, bound)
        b = jax.random.uniform(kb, (embed_dim,), jnp.float32, -bound, bound)
        return w, b

    wq, bq = lin(keys[0], keys[1])
    wk, bk = lin(keys[2], keys[3])
    wv, bv = lin(keys[4], keys[5])
    wo, bo = lin(keys[6], keys[7])
    return dict(wq=wq, bq=bq, wk=wk, bk=bk, wv=wv, bv=bv, wo=wo, bo=bo)


def multi_head_attention_forward(x, params, *, num_heads,
                                 compute_dtype=jnp.float32):
    B, S, E = x.shape
    Dh = E // num_heads
    scale = float(Dh) ** -0.5

    # Fused QKV projection: one pass over x, one (E, 3E) matmul.
    w_qkv = jnp.concatenate([params["wq"], params["wk"], params["wv"]], axis=1)
    b_qkv = jnp.concatenate([params["bq"], params["bk"], params["bv"]], axis=0)

    xf = x.reshape(B * S, E).astype(compute_dtype)
    qkv = pallas_linear(xf, w_qkv.astype(compute_dtype), b_qkv,
                        out_dtype=compute_dtype)                # (B*S, 3E)
    qkv = qkv.reshape(B, S, 3 * E)
    q = qkv[:, :, 0:E]
    k = qkv[:, :, E:2 * E]
    v = qkv[:, :, 2 * E:3 * E]

    # Flash attention; head split/merge handled inside the kernel (no transposes).
    attn = pallas_flash_attention(q, k, v, num_heads=num_heads, scale=scale,
                                  compute_dtype=compute_dtype)  # (B, S, E)

    out = pallas_linear(attn.reshape(B * S, E),
                        params["wo"].astype(compute_dtype), params["bo"],
                        out_dtype=jnp.float32)
    return out.reshape(B, S, E)


# --------------------------------- reference -----------------------------------

def reference_forward(x, params, num_heads):
    B, S, E = x.shape
    Dh = E // num_heads
    scale = float(Dh) ** -0.5

    def lin(t, w, b):
        return t @ w + b

    q = lin(x, params["wq"], params["bq"]).reshape(B, S, num_heads, Dh).transpose(0, 2, 1, 3)
    k = lin(x, params["wk"], params["bk"]).reshape(B, S, num_heads, Dh).transpose(0, 2, 1, 3)
    v = lin(x, params["wv"], params["bv"]).reshape(B, S, num_heads, Dh).transpose(0, 2, 1, 3)
    scores = jnp.einsum("bhqd,bhkd->bhqk", q, k) * scale
    w = jax.nn.softmax(scores, axis=-1)
    o = jnp.einsum("bhqk,bhkd->bhqd", w, v)
    o = o.transpose(0, 2, 1, 3).reshape(B, S, E)
    return lin(o, params["wo"], params["bo"])


# ----------------------------------- main ---------------------------------------

if __name__ == "__main__":
    key = jax.random.PRNGKey(0)
    k_x, k_p = jax.random.split(key)

    batch, seq_len, embed_dim, num_heads = 2, 8, 32, 4
    # block_size only affects the torch flash-loop path; the math is identical,
    # and the Pallas kernel's KV tiling plays the same role on TPU.

    x = jax.random.normal(k_x, (batch, seq_len, embed_dim), dtype=jnp.float32)
    params = init_params(k_p, embed_dim)

    fwd = jax.jit(multi_head_attention_forward,
                  static_argnames=("num_heads", "compute_dtype"))

    ref = reference_forward(x, params, num_heads)

    # Strict f32 correctness check.
    out_f32 = jax.block_until_ready(
        fwd(x, params, num_heads=num_heads, compute_dtype=jnp.float32))
    np.testing.assert_allclose(np.asarray(out_f32), np.asarray(ref),
                               rtol=1e-4, atol=1e-4)

    # bf16 MXU path (f32 accumulation in-kernel): looser tolerance.
    out_bf16 = jax.block_until_ready(
        fwd(x, params, num_heads=num_heads, compute_dtype=jnp.bfloat16))
    np.testing.assert_allclose(np.asarray(out_bf16), np.asarray(ref),
                               rtol=8e-2, atol=8e-2)

    print("KERNEL_OK")
</pallas_src>

<mosaic_0001>
module attributes {stable_mosaic.version = 11 : i64} {
  func.func @_linear_kernel(%arg0: i32, %arg1: i32, %arg2: i32, %arg3: memref<16x32xf32, #tpu.memory_space<vmem>>, %arg4: memref<32x96xf32, #tpu.memory_space<vmem>>, %arg5: memref<1x96xf32, #tpu.memory_space<vmem>>, %arg6: memref<16x96xf32, #tpu.memory_space<vmem>>, %arg7: memref<16x96xf32, #tpu.memory_space<vmem>>) attributes {dimension_semantics = [#tpu.dimension_semantics<parallel>, #tpu.dimension_semantics<parallel>, #tpu.dimension_semantics<arbitrary>], iteration_bounds = array<i64: 1, 1, 1>, scalar_prefetch = 0 : i64, scratch_operands = 1 : i64, tpu.core_type = #tpu.core_type<tc>, window_params = [{transform_indices = @transform_0, window_bounds = array<i64: 16, 32>}, {transform_indices = @transform_1, window_bounds = array<i64: 32, 96>}, {transform_indices = @transform_2, window_bounds = array<i64: 1, 96>}, {transform_indices = @transform_3, window_bounds = array<i64: 16, 96>}]} {
    %c0_i32 = arith.constant 0 : i32
    %0 = arith.cmpi eq, %arg2, %c0_i32 : i32
    %1 = arith.extui %0 : i1 to i32
    %c0_i32_0 = arith.constant 0 : i32
    %2 = arith.cmpi ne, %1, %c0_i32_0 : i32
    scf.if %2 {
      %cst_10 = arith.constant 0.000000e+00 : f32
      %12 = vector.broadcast %cst_10 : f32 to vector<16x96xf32>
      %c0_11 = arith.constant 0 : index
      %c0_12 = arith.constant 0 : index
      %13 = vector.load %arg7[%c0_11, %c0_12] : memref<16x96xf32, #tpu.memory_space<vmem>>, vector<16x96xf32>
      tpu.vector_store %arg7[%c0_11, %c0_12], %12 {strides = array<i32>} : memref<16x96xf32, #tpu.memory_space<vmem>>, vector<16x96xf32>,
    } else {
    }
    %c0 = arith.constant 0 : index
    %c0_1 = arith.constant 0 : index
    %3 = vector.load %arg7[%c0, %c0_1] : memref<16x96xf32, #tpu.memory_space<vmem>>, vector<16x96xf32>
    %c0_2 = arith.constant 0 : index
    %c0_3 = arith.constant 0 : index
    %4 = vector.load %arg3[%c0_2, %c0_3] : memref<16x32xf32, #tpu.memory_space<vmem>>, vector<16x32xf32>
    %c0_4 = arith.constant 0 : index
    %c0_5 = arith.constant 0 : index
    %5 = vector.load %arg4[%c0_4, %c0_5] : memref<32x96xf32, #tpu.memory_space<vmem>>, vector<32x96xf32>
    %cst = arith.constant dense<0.000000e+00> : vector<16x96xf32>
    %6 = tpu.matmul %4, %5, %cst {dimension_numbers = #tpu.dot_dimension_numbers<[1], [0], [0], [1], [0, 0, 1, 1], [], []>} : vector<16x32xf32>, vector<32x96xf32>, vector<16x96xf32> -> vector<16x96xf32>
    %7 = arith.addf %3, %6 : vector<16x96xf32>
    %c0_6 = arith.constant 0 : index
    %c0_7 = arith.constant 0 : index
    %8 = vector.load %arg7[%c0_6, %c0_7] : memref<16x96xf32, #tpu.memory_space<vmem>>, vector<16x96xf32>
    tpu.vector_store %arg7[%c0_6, %c0_7], %7 {strides = array<i32>} : memref<16x96xf32, #tpu.memory_space<vmem>>, vector<16x96xf32>,
    %c0_i32_8 = arith.constant 0 : i32
    %9 = arith.cmpi eq, %arg2, %c0_i32_8 : i32
    %10 = arith.extui %9 : i1 to i32
    %c0_i32_9 = arith.constant 0 : i32
    %11 = arith.cmpi ne, %10, %c0_i32_9 : i32
    scf.if %11 {
      %c0_10 = arith.constant 0 : index
      %c0_11 = arith.constant 0 : index
      %12 = vector.load %arg7[%c0_10, %c0_11] : memref<16x96xf32, #tpu.memory_space<vmem>>, vector<16x96xf32>
      %c0_12 = arith.constant 0 : index
      %c0_13 = arith.constant 0 : index
      %13 = vector.load %arg5[%c0_12, %c0_13] : memref<1x96xf32, #tpu.memory_space<vmem>>, vector<1x96xf32>
      %14 = vector.broadcast %13 : vector<1x96xf32> to vector<16x96xf32>
      %15 = arith.addf %12, %14 : vector<16x96xf32>
      %c0_14 = arith.constant 0 : index
      %c0_15 = arith.constant 0 : index
      %16 = vector.load %arg6[%c0_14, %c0_15] : memref<16x96xf32, #tpu.memory_space<vmem>>, vector<16x96xf32>
      tpu.vector_store %arg6[%c0_14, %c0_15], %15 {strides = array<i32>} : memref<16x96xf32, #tpu.memory_space<vmem>>, vector<16x96xf32>,
    } else {
    }
    return
  }
  func.func @transform_0(%arg0: i32, %arg1: i32, %arg2: i32) -> (i32, i32) {
    %c0_i32 = arith.constant 0 : i32
    return %arg0, %arg2 : i32, i32
  }
  func.func @transform_1(%arg0: i32, %arg1: i32, %arg2: i32) -> (i32, i32) {
    %c0_i32 = arith.constant 0 : i32
    return %arg2, %arg1 : i32, i32
  }
  func.func @transform_2(%arg0: i32, %arg1: i32, %arg2: i32) -> (i32, i32) {
    %c0_i32 = arith.constant 0 : i32
    %c0_i32_0 = arith.constant 0 : i32
    return %c0_i32, %arg1 : i32, i32
  }
  func.func @transform_3(%arg0: i32, %arg1: i32, %arg2: i32) -> (i32, i32) {
    %c0_i32 = arith.constant 0 : i32
    return %arg0, %arg1 : i32, i32
  }
}

module attributes {stable_mosaic.version = 11 : i64} {
  func.func @_linear_kernel(%arg0: i32, %arg1: i32, %arg2: i32, %arg3: memref<16x32xf32, #tpu.memory_space<vmem>>, %arg4: memref<32x32xf32, #tpu.memory_space<vmem>>, %arg5: memref<1x32xf32, #tpu.memory_space<vmem>>, %arg6: memref<16x32xf32, #tpu.memory_space<vmem>>, %arg7: memref<16x32xf32, #tpu.memory_space<vmem>>) attributes {dimension_semantics = [#tpu.dimension_semantics<parallel>, #tpu.dimension_semantics<parallel>, #tpu.dimension_semantics<arbitrary>], iteration_bounds = array<i64: 1, 1, 1>, scalar_prefetch = 0 : i64, scratch_operands = 1 : i64, tpu.core_type = #tpu.core_type<tc>, window_params = [{transform_indices = @transform_0, window_bounds = array<i64: 16, 32>}, {transform_indices = @transform_1, window_bounds = array<i64: 32, 32>}, {transform_indices = @transform_2, window_bounds = array<i64: 1, 32>}, {transform_indices = @transform_3, window_bounds = array<i64: 16, 32>}]} {
    %c0_i32 = arith.constant 0 : i32
    %0 = arith.cmpi eq, %arg2, %c0_i32 : i32
    %1 = arith.extui %0 : i1 to i32
    %c0_i32_0 = arith.constant 0 : i32
    %2 = arith.cmpi ne, %1, %c0_i32_0 : i32
    scf.if %2 {
      %cst_10 = arith.constant 0.000000e+00 : f32
      %12 = vector.broadcast %cst_10 : f32 to vector<16x32xf32>
      %c0_11 = arith.constant 0 : index
      %c0_12 = arith.constant 0 : index
      %13 = vector.load %arg7[%c0_11, %c0_12] : memref<16x32xf32, #tpu.memory_space<vmem>>, vector<16x32xf32>
      tpu.vector_store %arg7[%c0_11, %c0_12], %12 {strides = array<i32>} : memref<16x32xf32, #tpu.memory_space<vmem>>, vector<16x32xf32>,
    } else {
    }
    %c0 = arith.constant 0 : index
    %c0_1 = arith.constant 0 : index
    %3 = vector.load %arg7[%c0, %c0_1] : memref<16x32xf32, #tpu.memory_space<vmem>>, vector<16x32xf32>
    %c0_2 = arith.constant 0 : index
    %c0_3 = arith.constant 0 : index
    %4 = vector.load %arg3[%c0_2, %c0_3] : memref<16x32xf32, #tpu.memory_space<vmem>>, vector<16x32xf32>
    %c0_4 = arith.constant 0 : index
    %c0_5 = arith.constant 0 : index
    %5 = vector.load %arg4[%c0_4, %c0_5] : memref<32x32xf32, #tpu.memory_space<vmem>>, vector<32x32xf32>
    %cst = arith.constant dense<0.000000e+00> : vector<16x32xf32>
    %6 = tpu.matmul %4, %5, %cst {dimension_numbers = #tpu.dot_dimension_numbers<[1], [0], [0], [1], [0, 0, 1, 1], [], []>} : vector<16x32xf32>, vector<32x32xf32>, vector<16x32xf32> -> vector<16x32xf32>
    %7 = arith.addf %3, %6 : vector<16x32xf32>
    %c0_6 = arith.constant 0 : index
    %c0_7 = arith.constant 0 : index
    %8 = vector.load %arg7[%c0_6, %c0_7] : memref<16x32xf32, #tpu.memory_space<vmem>>, vector<16x32xf32>
    tpu.vector_store %arg7[%c0_6, %c0_7], %7 {strides = array<i32>} : memref<16x32xf32, #tpu.memory_space<vmem>>, vector<16x32xf32>,
    %c0_i32_8 = arith.constant 0 : i32
    %9 = arith.cmpi eq, %arg2, %c0_i32_8 : i32
    %10 = arith.extui %9 : i1 to i32
    %c0_i32_9 = arith.constant 0 : i32
    %11 = arith.cmpi ne, %10, %c0_i32_9 : i32
    scf.if %11 {
      %c0_10 = arith.constant 0 : index
      %c0_11 = arith.constant 0 : index
      %12 = vector.load %arg7[%c0_10, %c0_11] : memref<16x32xf32, #tpu.memory_space<vmem>>, vector<16x32xf32>
      %c0_12 = arith.constant 0 : index
      %c0_13 = arith.constant 0 : index
      %13 = vector.load %arg5[%c0_12, %c0_13] : memref<1x32xf32, #tpu.memory_space<vmem>>, vector<1x32xf32>
      %14 = vector.broadcast %13 : vector<1x32xf32> to vector<16x32xf32>
      %15 = arith.addf %12, %14 : vector<16x32xf32>
      %c0_14 = arith.constant 0 : index
      %c0_15 = arith.constant 0 : index
      %16 = vector.load %arg6[%c0_14, %c0_15] : memref<16x32xf32, #tpu.memory_space<vmem>>, vector<16x32xf32>
      tpu.vector_store %arg6[%c0_14, %c0_15], %15 {strides = array<i32>} : memref<16x32xf32, #tpu.memory_space<vmem>>, vector<16x32xf32>,
    } else {
    }
    return
  }
  func.func @transform_0(%arg0: i32, %arg1: i32, %arg2: i32) -> (i32, i32) {
    %c0_i32 = arith.constant 0 : i32
    return %arg0, %arg2 : i32, i32
  }
  func.func @transform_1(%arg0: i32, %arg1: i32, %arg2: i32) -> (i32, i32) {
    %c0_i32 = arith.constant 0 : i32
    return %arg2, %arg1 : i32, i32
  }
  func.func @transform_2(%arg0: i32, %arg1: i32, %arg2: i32) -> (i32, i32) {
    %c0_i32 = arith.constant 0 : i32
    %c0_i32_0 = arith.constant 0 : i32
    return %c0_i32, %arg1 : i32, i32
  }
  func.func @transform_3(%arg0: i32, %arg1: i32, %arg2: i32) -> (i32, i32) {
    %c0_i32 = arith.constant 0 : i32
    return %arg0, %arg1 : i32, i32
  }
}

module attributes {stable_mosaic.version = 11 : i64} {
  func.func @kernel(%arg0: i32, %arg1: i32, %arg2: i32, %arg3: memref<1x8x32xf32, #tpu.memory_space<vmem>>, %arg4: memref<1x8x32xf32, #tpu.memory_space<vmem>>, %arg5: memref<1x8x32xf32, #tpu.memory_space<vmem>>, %arg6: memref<1x8x32xf32, #tpu.memory_space<vmem>>, %arg7: memref<4x8x1xf32, #tpu.memory_space<vmem>>, %arg8: memref<4x8x1xf32, #tpu.memory_space<vmem>>, %arg9: memref<8x32xf32, #tpu.memory_space<vmem>>) attributes {dimension_semantics = [#tpu.dimension_semantics<parallel>, #tpu.dimension_semantics<parallel>, #tpu.dimension_semantics<arbitrary>], iteration_bounds = array<i64: 2, 1, 1>, scalar_prefetch = 0 : i64, scratch_operands = 3 : i64, tpu.core_type = #tpu.core_type<tc>, window_params = [{transform_indices = @transform_0, window_bounds = array<i64: 1, 8, 32>}, {transform_indices = @transform_1, window_bounds = array<i64: 1, 8, 32>}, {transform_indices = @transform_2, window_bounds = array<i64: 1, 8, 32>}, {transform_indices = @transform_3, window_bounds = array<i64: 1, 8, 32>}]} {
    %c0_i32 = arith.constant 0 : i32
    %0 = arith.cmpi eq, %arg2, %c0_i32 : i32
    %1 = arith.extui %0 : i1 to i32
    %c0_i32_0 = arith.constant 0 : i32
    %2 = arith.cmpi ne, %1, %c0_i32_0 : i32
    scf.if %2 {
      %cst_88 = arith.constant 0xFF800000 : f32
      %148 = vector.broadcast %cst_88 : f32 to vector<4x8x1xf32>
      %c0_89 = arith.constant 0 : index
      %c0_90 = arith.constant 0 : index
      %c0_91 = arith.constant 0 : index
      %149 = vector.load %arg7[%c0_89, %c0_90, %c0_91] : memref<4x8x1xf32, #tpu.memory_space<vmem>>, vector<4x8x1xf32>
      tpu.vector_store %arg7[%c0_89, %c0_90, %c0_91], %148 {strides = array<i32>} : memref<4x8x1xf32, #tpu.memory_space<vmem>>, vector<4x8x1xf32>,
      %cst_92 = arith.constant 0.000000e+00 : f32
      %150 = vector.broadcast %cst_92 : f32 to vector<4x8x1xf32>
      %c0_93 = arith.constant 0 : index
      %c0_94 = arith.constant 0 : index
      %c0_95 = arith.constant 0 : index
      %151 = vector.load %arg8[%c0_93, %c0_94, %c0_95] : memref<4x8x1xf32, #tpu.memory_space<vmem>>, vector<4x8x1xf32>
      tpu.vector_store %arg8[%c0_93, %c0_94, %c0_95], %150 {strides = array<i32>} : memref<4x8x1xf32, #tpu.memory_space<vmem>>, vector<4x8x1xf32>,
      %cst_96 = arith.constant 0.000000e+00 : f32
      %152 = vector.broadcast %cst_96 : f32 to vector<8x32xf32>
      %c0_97 = arith.constant 0 : index
      %c0_98 = arith.constant 0 : index
      %153 = vector.load %arg9[%c0_97, %c0_98] : memref<8x32xf32, #tpu.memory_space<vmem>>, vector<8x32xf32>
      tpu.vector_store %arg9[%c0_97, %c0_98], %152 {strides = array<i32>} : memref<8x32xf32, #tpu.memory_space<vmem>>, vector<8x32xf32>,
    } else {
    }
    %c0 = arith.constant 0 : index
    %c0_1 = arith.constant 0 : index
    %c0_2 = arith.constant 0 : index
    %3 = vector.load %arg3[%c0, %c0_1, %c0_2] : memref<1x8x32xf32, #tpu.memory_space<vmem>>, vector<1x8x32xf32>
    %4 = vector.shape_cast %3 : vector<1x8x32xf32> to vector<8x32xf32>
    %c0_3 = arith.constant 0 : index
    %c0_4 = arith.constant 0 : index
    %c0_5 = arith.constant 0 : index
    %5 = vector.load %arg4[%c0_3, %c0_4, %c0_5] : memref<1x8x32xf32, #tpu.memory_space<vmem>>, vector<1x8x32xf32>
    %6 = vector.shape_cast %5 : vector<1x8x32xf32> to vector<8x32xf32>
    %c0_6 = arith.constant 0 : index
    %c0_7 = arith.constant 0 : index
    %c0_8 = arith.constant 0 : index
    %7 = vector.load %arg5[%c0_6, %c0_7, %c0_8] : memref<1x8x32xf32, #tpu.memory_space<vmem>>, vector<1x8x32xf32>
    %8 = vector.shape_cast %7 : vector<1x8x32xf32> to vector<8x32xf32>
    %9 = vector.extract_strided_slice %4 {offsets = [0, 0], sizes = [8, 8], strides = [1, 1]} : vector<8x32xf32> to vector<8x8xf32>
    %cst = arith.constant 0.353553385 : f32
    %10 = vector.broadcast %cst : f32 to vector<8x8xf32>
    %11 = arith.mulf %9, %10 : vector<8x8xf32>
    %12 = vector.extract_strided_slice %6 {offsets = [0, 0], sizes = [8, 8], strides = [1, 1]} : vector<8x32xf32> to vector<8x8xf32>
    %13 = vector.extract_strided_slice %8 {offsets = [0, 0], sizes = [8, 8], strides = [1, 1]} : vector<8x32xf32> to vector<8x8xf32>
    %cst_9 = arith.constant dense<0.000000e+00> : vector<8x8xf32>
    %14 = tpu.matmul %11, %12, %cst_9 {dimension_numbers = #tpu.dot_dimension_numbers<[1], [1], [0], [0], [0, 0, 1, 0], [], []>} : vector<8x8xf32>, vector<8x8xf32>, vector<8x8xf32> -> vector<8x8xf32>
    %c0_10 = arith.constant 0 : index
    %c0_11 = arith.constant 0 : index
    %c0_12 = arith.constant 0 : index
    %15 = vector.load %arg7[%c0_10, %c0_11, %c0_12] : memref<4x8x1xf32, #tpu.memory_space<vmem>>, vector<1x8x1xf32>
    %16 = vector.shape_cast %15 : vector<1x8x1xf32> to vector<8x1xf32>
    %cst_13 = arith.constant dense<0xFF800000> : vector<8xf32>
    %17 = vector.multi_reduction <maximumf>, %14, %cst_13 [1] : vector<8x8xf32> to vector<8xf32>
    %18 = vector.shape_cast %17 : vector<8xf32> to vector<8x1xf32>
    %19 = arith.maximumf %16, %18 : vector<8x1xf32>
    %20 = arith.subf %16, %19 : vector<8x1xf32>
    %21 = math.exp %20 : vector<8x1xf32>
    %22 = vector.broadcast %19 : vector<8x1xf32> to vector<8x8xf32>
    %23 = arith.subf %14, %22 : vector<8x8xf32>
    %24 = math.exp %23 : vector<8x8xf32>
    %c0_14 = arith.constant 0 : index
    %c0_15 = arith.constant 0 : index
    %c0_16 = arith.constant 0 : index
    %25 = vector.load %arg8[%c0_14, %c0_15, %c0_16] : memref<4x8x1xf32, #tpu.memory_space<vmem>>, vector<1x8x1xf32>
    %26 = vector.shape_cast %25 : vector<1x8x1xf32> to vector<8x1xf32>
    %27 = arith.mulf %21, %26 : vector<8x1xf32>
    %cst_17 = arith.constant dense<0.000000e+00> : vector<8xf32>
    %28 = vector.multi_reduction <add>, %24, %cst_17 [1] : vector<8x8xf32> to vector<8xf32>
    %29 = vector.shape_cast %28 : vector<8xf32> to vector<8x1xf32>
    %30 = arith.addf %27, %29 : vector<8x1xf32>
    %c0_18 = arith.constant 0 : index
    %c0_19 = arith.constant 0 : index
    %c0_20 = arith.constant 0 : index
    %31 = vector.load %arg8[%c0_18, %c0_19, %c0_20] : memref<4x8x1xf32, #tpu.memory_space<vmem>>, vector<1x8x1xf32>
    %32 = vector.shape_cast %31 : vector<1x8x1xf32> to vector<8x1xf32>
    %33 = vector.shape_cast %30 : vector<8x1xf32> to vector<1x8x1xf32>
    tpu.vector_store %arg8[%c0_18, %c0_19, %c0_20], %33 {strides = array<i32>} : memref<4x8x1xf32, #tpu.memory_space<vmem>>, vector<1x8x1xf32>,
    %c0_21 = arith.constant 0 : index
    %c0_22 = arith.constant 0 : index
    %34 = vector.load %arg9[%c0_21, %c0_22] : memref<8x32xf32, #tpu.memory_space<vmem>>, vector<8x8xf32>
    %35 = vector.broadcast %21 : vector<8x1xf32> to vector<8x8xf32>
    %36 = arith.mulf %35, %34 : vector<8x8xf32>
    %cst_23 = arith.constant dense<0.000000e+00> : vector<8x8xf32>
    %37 = tpu.matmul %24, %13, %cst_23 {dimension_numbers = #tpu.dot_dimension_numbers<[1], [0], [0], [1], [0, 0, 1, 1], [], []>} : vector<8x8xf32>, vector<8x8xf32>, vector<8x8xf32> -> vector<8x8xf32>
    %38 = arith.addf %36, %37 : vector<8x8xf32>
    %c0_24 = arith.constant 0 : index
    %c0_25 = arith.constant 0 : index
    %39 = vector.load %arg9[%c0_24, %c0_25] : memref<8x32xf32, #tpu.memory_space<vmem>>, vector<8x8xf32>
    tpu.vector_store %arg9[%c0_24, %c0_25], %38 {strides = array<i32>} : memref<8x32xf32, #tpu.memory_space<vmem>>, vector<8x8xf32>,
    %c0_26 = arith.constant 0 : index
    %c0_27 = arith.constant 0 : index
    %c0_28 = arith.constant 0 : index
    %40 = vector.load %arg7[%c0_26, %c0_27, %c0_28] : memref<4x8x1xf32, #tpu.memory_space<vmem>>, vector<1x8x1xf32>
    %41 = vector.shape_cast %40 : vector<1x8x1xf32> to vector<8x1xf32>
    %42 = vector.shape_cast %19 : vector<8x1xf32> to vector<1x8x1xf32>
    tpu.vector_store %arg7[%c0_26, %c0_27, %c0_28], %42 {strides = array<i32>} : memref<4x8x1xf32, #tpu.memory_space<vmem>>, vector<1x8x1xf32>,
    %43 = vector.extract_strided_slice %4 {offsets = [0, 8], sizes = [8, 8], strides = [1, 1]} : vector<8x32xf32> to vector<8x8xf32>
    %cst_29 = arith.constant 0.353553385 : f32
    %44 = vector.broadcast %cst_29 : f32 to vector<8x8xf32>
    %45 = arith.mulf %43, %44 : vector<8x8xf32>
    %46 = vector.extract_strided_slice %6 {offsets = [0, 8], sizes = [8, 8], strides = [1, 1]} : vector<8x32xf32> to vector<8x8xf32>
    %47 = vector.extract_strided_slice %8 {offsets = [0, 8], sizes = [8, 8], strides = [1, 1]} : vector<8x32xf32> to vector<8x8xf32>
    %cst_30 = arith.constant dense<0.000000e+00> : vector<8x8xf32>
    %48 = tpu.matmul %45, %46, %cst_30 {dimension_numbers = #tpu.dot_dimension_numbers<[1], [1], [0], [0], [0, 0, 1, 0], [], []>} : vector<8x8xf32>, vector<8x8xf32>, vector<8x8xf32> -> vector<8x8xf32>
    %c1 = arith.constant 1 : index
    %c0_31 = arith.constant 0 : index
    %c0_32 = arith.constant 0 : index
    %49 = vector.load %arg7[%c1, %c0_31, %c0_32] : memref<4x8x1xf32, #tpu.memory_space<vmem>>, vector<1x8x1xf32>
    %50 = vector.shape_cast %49 : vector<1x8x1xf32> to vector<8x1xf32>
    %cst_33 = arith.constant dense<0xFF800000> : vector<8xf32>
    %51 = vector.multi_reduction <maximumf>, %48, %cst_33 [1] : vector<8x8xf32> to vector<8xf32>
    %52 = vector.shape_cast %51 : vector<8xf32> to vector<8x1xf32>
    %53 = arith.maximumf %50, %52 : vector<8x1xf32>
    %54 = arith.subf %50, %53 : vector<8x1xf32>
    %55 = math.exp %54 : vector<8x1xf32>
    %56 = vector.broadcast %53 : vector<8x1xf32> to vector<8x8xf32>
    %57 = arith.subf %48, %56 : vector<8x8xf32>
    %58 = math.exp %57 : vector<8x8xf32>
    %c1_34 = arith.constant 1 : index
    %c0_35 = arith.constant 0 : index
    %c0_36 = arith.constant 0 : index
    %59 = vector.load %arg8[%c1_34, %c0_35, %c0_36] : memref<4x8x1xf32, #tpu.memory_space<vmem>>, vector<1x8x1xf32>
    %60 = vector.shape_cast %59 : vector<1x8x1xf32> to vector<8x1xf32>
    %61 = arith.mulf %55, %60 : vector<8x1xf32>
    %cst_37 = arith.constant dense<0.000000e+00> : vector<8xf32>
    %62 = vector.multi_reduction <add>, %58, %cst_37 [1] : vector<8x8xf32> to vector<8xf32>
    %63 = vector.shape_cast %62 : vector<8xf32> to vector<8x1xf32>
    %64 = arith.addf %61, %63 : vector<8x1xf32>
    %c1_38 = arith.constant 1 : index
    %c0_39 = arith.constant 0 : index
    %c0_40 = arith.constant 0 : index
    %65 = vector.load %arg8[%c1_38, %c0_39, %c0_40] : memref<4x8x1xf32, #tpu.memory_space<vmem>>, vector<1x8x1xf32>
    %66 = vector.shape_cast %65 : vector<1x8x1xf32> to vector<8x1xf32>
    %67 = vector.shape_cast %64 : vector<8x1xf32> to vector<1x8x1xf32>
    tpu.vector_store %arg8[%c1_38, %c0_39, %c0_40], %67 {strides = array<i32>} : memref<4x8x1xf32, #tpu.memory_space<vmem>>, vector<1x8x1xf32>,
    %c0_41 = arith.constant 0 : index
    %c8 = arith.constant 8 : index
    %68 = vector.load %arg9[%c0_41, %c8] : memref<8x32xf32, #tpu.memory_space<vmem>>, vector<8x8xf32>
    %69 = vector.broadcast %55 : vector<8x1xf32> to vector<8x8xf32>
    %70 = arith.mulf %69, %68 : vector<8x8xf32>
    %cst_42 = arith.constant dense<0.000000e+00> : vector<8x8xf32>
    %71 = tpu.matmul %58, %47, %cst_42 {dimension_numbers = #tpu.dot_dimension_numbers<[1], [0], [0], [1], [0, 0, 1, 1], [], []>} : vector<8x8xf32>, vector<8x8xf32>, vector<8x8xf32> -> vector<8x8xf32>
    %72 = arith.addf %70, %71 : vector<8x8xf32>
    %c0_43 = arith.constant 0 : index
    %c8_44 = arith.constant 8 : index
    %73 = vector.load %arg9[%c0_43, %c8_44] : memref<8x32xf32, #tpu.memory_space<vmem>>, vector<8x8xf32>
    tpu.vector_store %arg9[%c0_43, %c8_44], %72 {strides = array<i32>} : memref<8x32xf32, #tpu.memory_space<vmem>>, vector<8x8xf32>,
    %c1_45 = arith.constant 1 : index
    %c0_46 = arith.constant 0 : index
    %c0_47 = arith.constant 0 : index
    %74 = vector.load %arg7[%c1_45, %c0_46, %c0_47] : memref<4x8x1xf32, #tpu.memory_space<vmem>>, vector<1x8x1xf32>
    %75 = vector.shape_cast %74 : vector<1x8x1xf32> to vector<8x1xf32>
    %76 = vector.shape_cast %53 : vector<8x1xf32> to vector<1x8x1xf32>
    tpu.vector_store %arg7[%c1_45, %c0_46, %c0_47], %76 {strides = array<i32>} : memref<4x8x1xf32, #tpu.memory_space<vmem>>, vector<1x8x1xf32>,
    %77 = vector.extract_strided_slice %4 {offsets = [0, 16], sizes = [8, 8], strides = [1, 1]} : vector<8x32xf32> to vector<8x8xf32>
    %cst_48 = arith.constant 0.353553385 : f32
    %78 = vector.broadcast %cst_48 : f32 to vector<8x8xf32>
    %79 = arith.mulf %77, %78 : vector<8x8xf32>
    %80 = vector.extract_strided_slice %6 {offsets = [0, 16], sizes = [8, 8], strides = [1, 1]} : vector<8x32xf32> to vector<8x8xf32>
    %81 = vector.extract_strided_slice %8 {offsets = [0, 16], sizes = [8, 8], strides = [1, 1]} : vector<8x32xf32> to vector<8x8xf32>
    %cst_49 = arith.constant dense<0.000000e+00> : vector<8x8xf32>
    %82 = tpu.matmul %79, %80, %cst_49 {dimension_numbers = #tpu.dot_dimension_numbers<[1], [1], [0], [0], [0, 0, 1, 0], [], []>} : vector<8x8xf32>, vector<8x8xf32>, vector<8x8xf32> -> vector<8x8xf32>
    %c2 = arith.constant 2 : index
    %c0_50 = arith.constant 0 : index
    %c0_51 = arith.constant 0 : index
    %83 = vector.load %arg7[%c2, %c0_50, %c0_51] : memref<4x8x1xf32, #tpu.memory_space<vmem>>, vector<1x8x1xf32>
    %84 = vector.shape_cast %83 : vector<1x8x1xf32> to vector<8x1xf32>
    %cst_52 = arith.constant dense<0xFF800000> : vector<8xf32>
    %85 = vector.multi_reduction <maximumf>, %82, %cst_52 [1] : vector<8x8xf32> to vector<8xf32>
    %86 = vector.shape_cast %85 : vector<8xf32> to vector<8x1xf32>
    %87 = arith.maximumf %84, %86 : vector<8x1xf32>
    %88 = arith.subf %84, %87 : vector<8x1xf32>
    %89 = math.exp %88 : vector<8x1xf32>
    %90 = vector.broadcast %87 : vector<8x1xf32> to vector<8x8xf32>
    %91 = arith.subf %82, %90 : vector<8x8xf32>
    %92 = math.exp %91 : vector<8x8xf32>
    %c2_53 = arith.constant 2 : index
    %c0_54 = arith.constant 0 : index
    %c0_55 = arith.constant 0 : index
    %93 = vector.load %arg8[%c2_53, %c0_54, %c0_55] : memref<4x8x1xf32, #tpu.memory_space<vmem>>, vector<1x8x1xf32>
    %94 = vector.shape_cast %93 : vector<1x8x1xf32> to vector<8x1xf32>
    %95 = arith.mulf %89, %94 : vector<8x1xf32>
    %cst_56 = arith.constant dense<0.000000e+00> : vector<8xf32>
    %96 = vector.multi_reduction <add>, %92, %cst_56 [1] : vector<8x8xf32> to vector<8xf32>
    %97 = vector.shape_cast %96 : vector<8xf32> to vector<8x1xf32>
    %98 = arith.addf %95, %97 : vector<8x1xf32>
    %c2_57 = arith.constant 2 : index
    %c0_58 = arith.constant 0 : index
    %c0_59 = arith.constant 0 : index
    %99 = vector.load %arg8[%c2_57, %c0_58, %c0_59] : memref<4x8x1xf32, #tpu.memory_space<vmem>>, vector<1x8x1xf32>
    %100 = vector.shape_cast %99 : vector<1x8x1xf32> to vector<8x1xf32>
    %101 = vector.shape_cast %98 : vector<8x1xf32> to vector<1x8x1xf32>
    tpu.vector_store %arg8[%c2_57, %c0_58, %c0_59], %101 {strides = array<i32>} : memref<4x8x1xf32, #tpu.memory_space<vmem>>, vector<1x8x1xf32>,
    %c0_60 = arith.constant 0 : index
    %c16 = arith.constant 16 : index
    %102 = vector.load %arg9[%c0_60, %c16] : memref<8x32xf32, #tpu.memory_space<vmem>>, vector<8x8xf32>
    %103 = vector.broadcast %89 : vector<8x1xf32> to vector<8x8xf32>
    %104 = arith.mulf %103, %102 : vector<8x8xf32>
    %cst_61 = arith.constant dense<0.000000e+00> : vector<8x8xf32>
    %105 = tpu.matmul %92, %81, %cst_61 {dimension_numbers = #tpu.dot_dimension_numbers<[1], [0], [0], [1], [0, 0, 1, 1], [], []>} : vector<8x8xf32>, vector<8x8xf32>, vector<8x8xf32> -> vector<8x8xf32>
    %106 = arith.addf %104, %105 : vector<8x8xf32>
    %c0_62 = arith.constant 0 : index
    %c16_63 = arith.constant 16 : index
    %107 = vector.load %arg9[%c0_62, %c16_63] : memref<8x32xf32, #tpu.memory_space<vmem>>, vector<8x8xf32>
    tpu.vector_store %arg9[%c0_62, %c16_63], %106 {strides = array<i32>} : memref<8x32xf32, #tpu.memory_space<vmem>>, vector<8x8xf32>,
    %c2_64 = arith.constant 2 : index
    %c0_65 = arith.constant 0 : index
    %c0_66 = arith.constant 0 : index
    %108 = vector.load %arg7[%c2_64, %c0_65, %c0_66] : memref<4x8x1xf32, #tpu.memory_space<vmem>>, vector<1x8x1xf32>
    %109 = vector.shape_cast %108 : vector<1x8x1xf32> to vector<8x1xf32>
    %110 = vector.shape_cast %87 : vector<8x1xf32> to vector<1x8x1xf32>
    tpu.vector_store %arg7[%c2_64, %c0_65, %c0_66], %110 {strides = array<i32>} : memref<4x8x1xf32, #tpu.memory_space<vmem>>, vector<1x8x1xf32>,
    %111 = vector.extract_strided_slice %4 {offsets = [0, 24], sizes = [8, 8], strides = [1, 1]} : vector<8x32xf32> to vector<8x8xf32>
    %cst_67 = arith.constant 0.353553385 : f32
    %112 = vector.broadcast %cst_67 : f32 to vector<8x8xf32>
    %113 = arith.mulf %111, %112 : vector<8x8xf32>
    %114 = vector.extract_strided_slice %6 {offsets = [0, 24], sizes = [8, 8], strides = [1, 1]} : vector<8x32xf32> to vector<8x8xf32>
    %115 = vector.extract_strided_slice %8 {offsets = [0, 24], sizes = [8, 8], strides = [1, 1]} : vector<8x32xf32> to vector<8x8xf32>
    %cst_68 = arith.constant dense<0.000000e+00> : vector<8x8xf32>
    %116 = tpu.matmul %113, %114, %cst_68 {dimension_numbers = #tpu.dot_dimension_numbers<[1], [1], [0], [0], [0, 0, 1, 0], [], []>} : vector<8x8xf32>, vector<8x8xf32>, vector<8x8xf32> -> vector<8x8xf32>
    %c3 = arith.constant 3 : index
    %c0_69 = arith.constant 0 : index
    %c0_70 = arith.constant 0 : index
    %117 = vector.load %arg7[%c3, %c0_69, %c0_70] : memref<4x8x1xf32, #tpu.memory_space<vmem>>, vector<1x8x1xf32>
    %118 = vector.shape_cast %117 : vector<1x8x1xf32> to vector<8x1xf32>
    %cst_71 = arith.constant dense<0xFF800000> : vector<8xf32>
    %119 = vector.multi_reduction <maximumf>, %116, %cst_71 [1] : vector<8x8xf32> to vector<8xf32>
    %120 = vector.shape_cast %119 : vector<8xf32> to vector<8x1xf32>
    %121 = arith.maximumf %118, %120 : vector<8x1xf32>
    %122 = arith.subf %118, %121 : vector<8x1xf32>
    %123 = math.exp %122 : vector<8x1xf32>
    %124 = vector.broadcast %121 : vector<8x1xf32> to vector<8x8xf32>
    %125 = arith.subf %116, %124 : vector<8x8xf32>
    %126 = math.exp %125 : vector<8x8xf32>
    %c3_72 = arith.constant 3 : index
    %c0_73 = arith.constant 0 : index
    %c0_74 = arith.constant 0 : index
    %127 = vector.load %arg8[%c3_72, %c0_73, %c0_74] : memref<4x8x1xf32, #tpu.memory_space<vmem>>, vector<1x8x1xf32>
    %128 = vector.shape_cast %127 : vector<1x8x1xf32> to vector<8x1xf32>
    %129 = arith.mulf %123, %128 : vector<8x1xf32>
    %cst_75 = arith.constant dense<0.000000e+00> : vector<8xf32>
    %130 = vector.multi_reduction <add>, %126, %cst_75 [1] : vector<8x8xf32> to vector<8xf32>
    %131 = vector.shape_cast %130 : vector<8xf32> to vector<8x1xf32>
    %132 = arith.addf %129, %131 : vector<8x1xf32>
    %c3_76 = arith.constant 3 : index
    %c0_77 = arith.constant 0 : index
    %c0_78 = arith.constant 0 : index
    %133 = vector.load %arg8[%c3_76, %c0_77, %c0_78] : memref<4x8x1xf32, #tpu.memory_space<vmem>>, vector<1x8x1xf32>
    %134 = vector.shape_cast %133 : vector<1x8x1xf32> to vector<8x1xf32>
    %135 = vector.shape_cast %132 : vector<8x1xf32> to vector<1x8x1xf32>
    tpu.vector_store %arg8[%c3_76, %c0_77, %c0_78], %135 {strides = array<i32>} : memref<4x8x1xf32, #tpu.memory_space<vmem>>, vector<1x8x1xf32>,
    %c0_79 = arith.constant 0 : index
    %c24 = arith.constant 24 : index
    %136 = vector.load %arg9[%c0_79, %c24] : memref<8x32xf32, #tpu.memory_space<vmem>>, vector<8x8xf32>
    %137 = vector.broadcast %123 : vector<8x1xf32> to vector<8x8xf32>
    %138 = arith.mulf %137, %136 : vector<8x8xf32>
    %cst_80 = arith.constant dense<0.000000e+00> : vector<8x8xf32>
    %139 = tpu.matmul %126, %115, %cst_80 {dimension_numbers = #tpu.dot_dimension_numbers<[1], [0], [0], [1], [0, 0, 1, 1], [], []>} : vector<8x8xf32>, vector<8x8xf32>, vector<8x8xf32> -> vector<8x8xf32>
    %140 = arith.addf %138, %139 : vector<8x8xf32>
    %c0_81 = arith.constant 0 : index
    %c24_82 = arith.constant 24 : index
    %141 = vector.load %arg9[%c0_81, %c24_82] : memref<8x32xf32, #tpu.memory_space<vmem>>, vector<8x8xf32>
    tpu.vector_store %arg9[%c0_81, %c24_82], %140 {strides = array<i32>} : memref<8x32xf32, #tpu.memory_space<vmem>>, vector<8x8xf32>,
    %c3_83 = arith.constant 3 : index
    %c0_84 = arith.constant 0 : index
    %c0_85 = arith.constant 0 : index
    %142 = vector.load %arg7[%c3_83, %c0_84, %c0_85] : memref<4x8x1xf32, #tpu.memory_space<vmem>>, vector<1x8x1xf32>
    %143 = vector.shape_cast %142 : vector<1x8x1xf32> to vector<8x1xf32>
    %144 = vector.shape_cast %121 : vector<8x1xf32> to vector<1x8x1xf32>
    tpu.vector_store %arg7[%c3_83, %c0_84, %c0_85], %144 {strides = array<i32>} : memref<4x8x1xf32, #tpu.memory_space<vmem>>, vector<1x8x1xf32>,
    %c0_i32_86 = arith.constant 0 : i32
    %145 = arith.cmpi eq, %arg2, %c0_i32_86 : i32
    %146 = arith.extui %145 : i1 to i32
    %c0_i32_87 = arith.constant 0 : i32
    %147 = arith.cmpi ne, %146, %c0_i32_87 : i32
    scf.if %147 {
      %c0_88 = arith.constant 0 : index
      %c0_89 = arith.constant 0 : index
      %c0_90 = arith.constant 0 : index
      %148 = vector.load %arg8[%c0_88, %c0_89, %c0_90] : memref<4x8x1xf32, #tpu.memory_space<vmem>>, vector<1x8x1xf32>
      %149 = vector.shape_cast %148 : vector<1x8x1xf32> to vector<8x1xf32>
      %150 = tpu.reciprocal %149 : vector<8x1xf32> -> vector<8x1xf32>
      %c0_91 = arith.constant 0 : index
      %c0_92 = arith.constant 0 : index
      %151 = vector.load %arg9[%c0_91, %c0_92] : memref<8x32xf32, #tpu.memory_space<vmem>>, vector<8x8xf32>
      %152 = vector.broadcast %150 : vector<8x1xf32> to vector<8x8xf32>
      %153 = arith.mulf %151, %152 : vector<8x8xf32>
      %c0_93 = arith.constant 0 : index
      %c0_94 = arith.constant 0 : index
      %154 = vector.load %arg9[%c0_93, %c0_94] : memref<8x32xf32, #tpu.memory_space<vmem>>, vector<8x8xf32>
      tpu.vector_store %arg9[%c0_93, %c0_94], %153 {strides = array<i32>} : memref<8x32xf32, #tpu.memory_space<vmem>>, vector<8x8xf32>,
      %c1_95 = arith.constant 1 : index
      %c0_96 = arith.constant 0 : index
      %c0_97 = arith.constant 0 : index
      %155 = vector.load %arg8[%c1_95, %c0_96, %c0_97] : memref<4x8x1xf32, #tpu.memory_space<vmem>>, vector<1x8x1xf32>
      %156 = vector.shape_cast %155 : vector<1x8x1xf32> to vector<8x1xf32>
      %157 = tpu.reciprocal %156 : vector<8x1xf32> -> vector<8x1xf32>
      %c0_98 = arith.constant 0 : index
      %c8_99 = arith.constant 8 : index
      %158 = vector.load %arg9[%c0_98, %c8_99] : memref<8x32xf32, #tpu.memory_space<vmem>>, vector<8x8xf32>
      %159 = vector.broadcast %157 : vector<8x1xf32> to vector<8x8xf32>
      %160 = arith.mulf %158, %159 : vector<8x8xf32>
      %c0_100 = arith.constant 0 : index
      %c8_101 = arith.constant 8 : index
      %161 = vector.load %arg9[%c0_100, %c8_101] : memref<8x32xf32, #tpu.memory_space<vmem>>, vector<8x8xf32>
      tpu.vector_store %arg9[%c0_100, %c8_101], %160 {strides = array<i32>} : memref<8x32xf32, #tpu.memory_space<vmem>>, vector<8x8xf32>,
      %c2_102 = arith.constant 2 : index
      %c0_103 = arith.constant 0 : index
      %c0_104 = arith.constant 0 : index
      %162 = vector.load %arg8[%c2_102, %c0_103, %c0_104] : memref<4x8x1xf32, #tpu.memory_space<vmem>>, vector<1x8x1xf32>
      %163 = vector.shape_cast %162 : vector<1x8x1xf32> to vector<8x1xf32>
      %164 = tpu.reciprocal %163 : vector<8x1xf32> -> vector<8x1xf32>
      %c0_105 = arith.constant 0 : index
      %c16_106 = arith.constant 16 : index
      %165 = vector.load %arg9[%c0_105, %c16_106] : memref<8x32xf32, #tpu.memory_space<vmem>>, vector<8x8xf32>
      %166 = vector.broadcast %164 : vector<8x1xf32> to vector<8x8xf32>
      %167 = arith.mulf %165, %166 : vector<8x8xf32>
      %c0_107 = arith.constant 0 : index
      %c16_108 = arith.constant 16 : index
      %168 = vector.load %arg9[%c0_107, %c16_108] : memref<8x32xf32, #tpu.memory_space<vmem>>, vector<8x8xf32>
      tpu.vector_store %arg9[%c0_107, %c16_108], %167 {strides = array<i32>} : memref<8x32xf32, #tpu.memory_space<vmem>>, vector<8x8xf32>,
      %c3_109 = arith.constant 3 : index
      %c0_110 = arith.constant 0 : index
      %c0_111 = arith.constant 0 : index
      %169 = vector.load %arg8[%c3_109, %c0_110, %c0_111] : memref<4x8x1xf32, #tpu.memory_space<vmem>>, vector<1x8x1xf32>
      %170 = vector.shape_cast %169 : vector<1x8x1xf32> to vector<8x1xf32>
      %171 = tpu.reciprocal %170 : vector<8x1xf32> -> vector<8x1xf32>
      %c0_112 = arith.constant 0 : index
      %c24_113 = arith.constant 24 : index
      %172 = vector.load %arg9[%c0_112, %c24_113] : memref<8x32xf32, #tpu.memory_space<vmem>>, vector<8x8xf32>
      %173 = vector.broadcast %171 : vector<8x1xf32> to vector<8x8xf32>
      %174 = arith.mulf %172, %173 : vector<8x8xf32>
      %c0_114 = arith.constant 0 : index
      %c24_115 = arith.constant 24 : index
      %175 = vector.load %arg9[%c0_114, %c24_115] : memref<8x32xf32, #tpu.memory_space<vmem>>, vector<8x8xf32>
      tpu.vector_store %arg9[%c0_114, %c24_115], %174 {strides = array<i32>} : memref<8x32xf32, #tpu.memory_space<vmem>>, vector<8x8xf32>,
      %c0_116 = arith.constant 0 : index
      %c0_117 = arith.constant 0 : index
      %176 = vector.load %arg9[%c0_116, %c0_117] : memref<8x32xf32, #tpu.memory_space<vmem>>, vector<8x32xf32>
      %c0_118 = arith.constant 0 : index
      %c0_119 = arith.constant 0 : index
      %c0_120 = arith.constant 0 : index
      %177 = vector.load %arg6[%c0_118, %c0_119, %c0_120] : memref<1x8x32xf32, #tpu.memory_space<vmem>>, vector<1x8x32xf32>
      %178 = vector.shape_cast %177 : vector<1x8x32xf32> to vector<8x32xf32>
      %179 = vector.shape_cast %176 : vector<8x32xf32> to vector<1x8x32xf32>
      tpu.vector_store %arg6[%c0_118, %c0_119, %c0_120], %179 {strides = array<i32>} : memref<1x8x32xf32, #tpu.memory_space<vmem>>, vector<1x8x32xf32>,
    } else {
    }
    return
  }
  func.func @transform_0(%arg0: i32, %arg1: i32, %arg2: i32) -> (i32, i32, i32) {
    %c0_i32 = arith.constant 0 : i32
    %c0_i32_0 = arith.constant 0 : i32
    return %arg0, %arg1, %c0_i32 : i32, i32, i32
  }
  func.func @transform_1(%arg0: i32, %arg1: i32, %arg2: i32) -> (i32, i32, i32) {
    %c0_i32 = arith.constant 0 : i32
    %c0_i32_0 = arith.constant 0 : i32
    return %arg0, %arg2, %c0_i32 : i32, i32, i32
  }
  func.func @transform_2(%arg0: i32, %arg1: i32, %arg2: i32) -> (i32, i32, i32) {
    %c0_i32 = arith.constant 0 : i32
    %c0_i32_0 = arith.constant 0 : i32
    return %arg0, %arg2, %c0_i32 : i32, i32, i32
  }
  func.func @transform_3(%arg0: i32, %arg1: i32, %arg2: i32) -> (i32, i32, i32) {
    %c0_i32 = arith.constant 0 : i32
    %c0_i32_0 = arith.constant 0 : i32
    return %arg0, %arg1, %c0_i32 : i32, i32, i32
  }
}

</mosaic_0001>

<bundles_post_ra>
// kernel: multi_head_attention_forward.3
= control target key start
LH: loop header
LB: loop body
LE: loop exit
PB: predicated region body
PF: predicated region fallthrough
CT: control target
= control target key end

     0   :  { %vm18_vm0 = vcmask 785408   ;;  %v89_v2 = vmov 0.0   ;;  %vm29_vm1 = vcmask 261120   ;;  %s143_s1 = inlined_call_operand.vmem [shape: f32[32,96], index: 1, kind: input, shape index: {}]   ;;  %s144_s2 = inlined_call_operand.vmem [shape: f32[1,96], index: 2, kind: input, shape index: {}]   ;;  %s145_s0 = inlined_call_operand.vmem [shape: f32[16,32], index: 0, kind: input, shape index: {}]   ;;  %s146_s3 = inlined_call_operand.vmem [shape: f32[16,96], index: 3, kind: output, shape index: {}]  }
   0x1   :  { %v28_v0 = vld [vmem:[%s143_s1 + $0x18] sm:$0xff]  ;;  %v27_v1 = vld [vmem:[%s143_s1 + $0x10] sm:$0xff]  ;;  %19 = vst.msk [vmem:[#allocation2] sm:$0xff] %vm18_vm0, %v89_v2  ;;  %v26_v3 = vld [vmem:[%s143_s1 + $0x8] sm:$0xff] }
   0x2   :  { %48 = vmatpush.msra.mxu0 %v28_v0  ;;  %83 = vmatpush.msra.mxu1 %v28_v0  ;;  %20 = vst.msk [vmem:[#allocation2 + $0x8] sm:$0xff] %vm18_vm0, %v89_v2  ;;  %v25_v4 = vld [vmem:[%s143_s1] sm:$0xff]  ;;  %v24_v6 = vld [vmem:[%s145_s0 + $0x8] sm:$0xff] }
   0x3   :  { %v23_v5 = vld [vmem:[%s145_s0] sm:$0xff] }
   0x4   :  { %49 = vmatpush.msra.mxu0 %v27_v1  ;;  %84 = vmatpush.msra.mxu1 %v27_v1  ;;  %v88_v13 = vld [vmem:[%s144_s2] ss:$0 sm:$0xff] }
   0x6   :  { %50 = vmatpush.msra.mxu0 %v26_v3  ;;  %85 = vmatpush.msra.mxu1 %v26_v3 }
   0x8   :  { %51 = vmatpush.msra.mxu0 %v25_v4  ;;  %86 = vmatpush.msra.mxu1 %v25_v4  ;;  %v21_v7 = vld [vmem:[#allocation2] sm:$0xff] }
   0x9   :  { %81 = vmatmul.msk.f32.vlgmr.msra.gmra.mxu0 %vm29_vm1, %v23_v5  ;;  %82 = vmatmul.msk.f32.vlgmr.msra.gmra.mxu1 %vm29_vm1, %v24_v6  ;;  %v22_v8 = vld [vmem:[#allocation2 + $0x8] sm:$0xff] }
  0x86   :  { %v53_v9 = vpop.f32.mrf.mxu0  ;;  %v56_v10 = vpop.f32.mrf.mxu1 }
  0x87   :  { %v59_v11 = vadd.f32 %v53_v9, %v21_v7  ;;  %v60_v12 = vadd.f32 %v56_v10, %v22_v8 }
  0x89   :  { %62 = vst.msk [vmem:[#allocation2] sm:$0xff] %vm18_vm0, %v59_v11 }
  0x8a   :  { %63 = vst.msk [vmem:[#allocation2 + $0x8] sm:$0xff] %vm18_vm0, %v60_v12 }
  0x90   :  { %v67_v14 = vld [vmem:[#allocation2] sm:$0xff] }
  0x91   :  { %v73_v15 = vadd.f32 %v88_v13, %v67_v14  ;;  %v68_v16 = vld [vmem:[#allocation2 + $0x8] sm:$0xff] }
  0x92   :  { %v74_v17 = vadd.f32 %v88_v13, %v68_v16 }
  0x93   :  { %75 = vst.msk [vmem:[%s146_s3] sm:$0xff] %vm18_vm0, %v73_v15 }
  0x94   :  { %76 = vst.msk [vmem:[%s146_s3 + $0x8] sm:$0xff] %vm18_vm0, %v74_v17 }

// kernel: multi_head_attention_forward.5
= control target key start
LH: loop header
LB: loop body
LE: loop exit
PB: predicated region body
PF: predicated region fallthrough
CT: control target
= control target key end

     0   :  { %vm19_vm0 = vcmask 261120   ;;  %v132_v2 = vmov 0.0   ;;  %s188_s0 = inlined_call_operand.vmem [shape: f32[16,32], index: 0, kind: input, shape index: {}]   ;;  %s189_s1 = inlined_call_operand.vmem [shape: f32[32,32], index: 1, kind: input, shape index: {}]   ;;  %s190_s2 = inlined_call_operand.vmem [shape: f32[1,32], index: 2, kind: input, shape index: {}]   ;;  %s191_s3 = inlined_call_operand.hbm [shape: f32[16,32], index: 3, kind: output, shape index: {}]  }
   0x1   :  { %v29_v0 = vld [vmem:[%s189_s1 + $0x18] sm:$0xff]  ;;  %v28_v1 = vld [vmem:[%s189_s1 + $0x10] sm:$0xff]  ;;  %20 = vst.msk [vmem:[#allocation2] sm:$0xff] %vm19_vm0, %v132_v2  ;;  %v27_v3 = vld [vmem:[%s189_s1 + $0x8] sm:$0xff] }
   0x2   :  { %49 = vmatpush.msra.mxu0 %v29_v0  ;;  %97 = vmatpush.msra.mxu1 %v29_v0  ;;  %21 = vst.msk [vmem:[#allocation2 + $0x8] sm:$0xff] %vm19_vm0, %v132_v2 }
   0x3   :  { %8 = vsyncpa [#allocation4], 0  ;;  %v26_v4 = vld [vmem:[%s189_s1] sm:$0xff]  ;;  %v25_v6 = vld [vmem:[%s188_s0 + $0x8] sm:$0xff]  ;;  %s83_s28 = sshll.u32 %s191_s3, 4  ;;  %s134_s29 = smov 128   ;;  %s84_s28 = int_to_ptr.hbm [resolvable:$true] %s83_s28 }
   0x4   :  { %50 = vmatpush.msra.mxu0 %v28_v1  ;;  %98 = vmatpush.msra.mxu1 %v28_v1  ;;  %v24_v5 = vld [vmem:[%s188_s0] sm:$0xff]  ;;  %s133_s0 = smov [#allocation3]   ;;  %s135_s30 = smov 8  }
   0x5   :  { %v105_v13 = vld [vmem:[%s190_s2] ss:$0 sm:$0xff]  ;;  %s81_s25 = sshll.u32 %s133_s0, 4  ;;  %s82_s25 = int_to_ptr.vmem [resolvable:$true] %s81_s25 }
   0x6   :  { %51 = vmatpush.msra.mxu0 %v27_v3  ;;  %99 = vmatpush.msra.mxu1 %v27_v3 }
   0x8   :  { %52 = vmatpush.msra.mxu0 %v26_v4  ;;  %100 = vmatpush.msra.mxu1 %v26_v4  ;;  %v22_v7 = vld [vmem:[#allocation2] sm:$0xff] }
   0x9   :  { %95 = vmatmul.msk.f32.vlgmr.msra.gmra.mxu0 %vm19_vm0, %v24_v5  ;;  %96 = vmatmul.msk.f32.vlgmr.msra.gmra.mxu1 %vm19_vm0, %v25_v6  ;;  %v23_v8 = vld [vmem:[#allocation2 + $0x8] sm:$0xff] }
  0x86   :  { %v54_v9 = vpop.f32.mrf.mxu0  ;;  %v57_v10 = vpop.f32.mrf.mxu1 }
  0x87   :  { %v60_v11 = vadd.f32 %v54_v9, %v22_v7  ;;  %v61_v12 = vadd.f32 %v57_v10, %v23_v8 }
  0x89   :  { %62 = vst.msk [vmem:[#allocation2] sm:$0xff] %vm19_vm0, %v60_v11 }
  0x8a   :  { %63 = vst.msk [vmem:[#allocation2 + $0x8] sm:$0xff] %vm19_vm0, %v61_v12 }
  0x90   :  { %v67_v14 = vld [vmem:[#allocation2] sm:$0xff] }
  0x91   :  { %v68_v15 = vld [vmem:[#allocation2 + $0x8] sm:$0xff]  ;;  %v73_v16 = vadd.f32 %v105_v13, %v67_v14 }
  0x92   :  { %v74_v17 = vadd.f32 %v105_v13, %v68_v15 }
  0x93   :  { %75 = vst.msk [vmem:[#allocation3] sm:$0xff] %vm19_vm0, %v73_v16 }
  0x94   :  { %76 = vst.msk [vmem:[#allocation3 + $0x8] sm:$0xff] %vm19_vm0, %v74_v17 }
  0x95   :  { %89 = dma.vmem_to_hbm [thread:$0]  %s82_s25, 256, %s84_s28, [#allocation4], %s134_s29, %s134_s29, %s135_s30  }
  0x96   :  { %130 = dma.done.wait [#allocation4], 256  }
  0x97   :  { %131 = vsyncadd [#allocation4], 4294967040 }
  0x98   :  { %94 = vsyncpa [#allocation4], 1 }

// kernel: multi_head_attention_forward.4
= control target key start
LH: loop header
LB: loop body
LE: loop exit
PB: predicated region body
PF: predicated region fallthrough
CT: control target
= control target key end

     0   :  { %s987_s12 = smov 0   ;;  %s989_s13 = smov 0   ;;  %s1120_s0 = inlined_call_operand.vmem [shape: f32[2,8,32], index: 0, kind: input, shape index: {}]   ;;  %s1121_s1 = inlined_call_operand.vmem [shape: f32[2,8,32], index: 1, kind: input, shape index: {}]   ;;  %s1122_s2 = inlined_call_operand.vmem [shape: f32[2,8,32], index: 2, kind: input, shape index: {}]   ;;  %s1123_s3 = inlined_call_operand.vmem [shape: f32[2,8,32], index: 3, kind: output, shape index: {}]  }
   0x1   :  { %s991_s14 = smov 0  }
   0x2 LB: > { %s32_s15 = sadd.s32 1, %s952_s13  ;;  %p855_p0 = scmp.ge.s32.totalorder %s956_s14, 1  ;;  %s956_s14 = sphi %s991_s14, %s13_s14   ;;  %s952_s13 = sphi %s989_s13, %s1125_s13   ;;  %s948_s12 = sphi %s987_s12, %s1124_s12  }
   0x3   : > { %p34_p1 = scmp.ge.s32.totalorder %s32_s15, 2  ;;  %p190_p2 = scmp.lt.s32.totalorder %s956_s14, 3 }
   0x5   : > { %s1127_s15 = smov (%p34_p1, %s32_s15), 0  ;;  %p191_p3 = pnand %p855_p0, %p190_p2 }
   0x6   : > { %p232_p4 = scmp.lt.s32.totalorder (!%p191_p3), %s948_s12, 1  ;;  %s959_s23 = smov (!%p191_p3), 112  }
   0x7   : > { %194 = sbr.rel (%p191_p3) target bundleno = 1192 (0x4a8), region = 32  ;;  %s960_s24 = smov (!%p191_p3), 120  }
   0x8   : > { %s961_s25 = smov (!%p191_p3), 104   ;;  %s964_s29 = smov (!%p191_p3), 8  }
   0x9   : > { %s965_s30 = smov (!%p191_p3), 16   ;;  %s966_s4 = smov (!%p191_p3), 24  }
   0xc   : > { %s1129_s12 = smov (!%p232_p4, %s948_s12), 1  ;;  %vm279_vm0 = vcmask 64512   ;;  %vm264_vm1 = vcmask 7168   ;;  %v958_v3 = vmov -inf   ;;  %v962_v6 = vmov 0  }
   0xd   : > { %s1005_s16 = sshll.u32 %s1129_s12, 3  ;;  %265 = vst.msk [vmem:[#allocation2] sm:$0xff] %vm264_vm1, %v958_v3  ;;  %907 = vset.pattern.permute.xlu1 %v962_v6  ;;  %908 = vset.pattern.permute.xlu2 %v962_v6  ;;  %v963_v7 = vmov 0.0   ;;  %vm273_vm2 = vcmask 261120   ;;  %vm455_vm15 = vcmask 130112  }
   0xe   : > { %s245_s19 = scalar_lea.vmem %s1121_s1, %s1005_s16  ;;  %s238_s22 = scalar_lea.vmem %s1120_s0, %s1005_s16  ;;  %266 = vst.msk [vmem:[#allocation2 + $0x8] sm:$0xff] %vm264_vm1, %v958_v3  ;;  %909 = vset.pattern.permute.xlu0 %v962_v6 }
   0xf   : > { %v276_v0 = vld [vmem:[%s245_s19] sm:$0xff]  ;;  %267 = vst.msk [vmem:[#allocation2 + $0x10] sm:$0xff] %vm264_vm1, %v958_v3  ;;  %s252_s28 = scalar_lea.vmem %s1122_s2, %s1005_s16  ;;  %s259_s7 = scalar_lea.vmem %s1123_s3, %s1005_s16 }
  0x10   : > { %860 = vmatpush.xpose.msk.msra.mxu0 %vm279_vm0, %v276_v0  ;;  %v275_v1 = vld [vmem:[%s238_s22] sm:$0xff]  ;;  %268 = vst.msk [vmem:[#allocation2 + $0x18] sm:$0xff] %vm264_vm1, %v958_v3  ;;  %460 = vrot.lane.b32.xlu2 %v276_v0, %s959_s23 }
  0x11   : > { %v278_v2 = vmul.f32 0.35355338, %v275_v1  ;;  %269 = vst.msk [vmem:[#allocation3] sm:$0xff] %vm264_vm1, %v963_v7  ;;  %v277_v13 = vld [vmem:[%s252_s28] sm:$0xff] }
  0x12   : > { %270 = vst.msk [vmem:[#allocation3 + $0x8] sm:$0xff] %vm264_vm1, %v963_v7  ;;  %355 = vmatpush.msra.mxu1 %v277_v13 }
  0x13   : > { %861 = vmatmul.msk.f32.vlgmr.msra.gmra.mxu0 %vm279_vm0, %v278_v2  ;;  %271 = vst.msk [vmem:[#allocation3 + $0x10] sm:$0xff] %vm264_vm1, %v963_v7 }
  0x14   : > { %272 = vst.msk [vmem:[#allocation3 + $0x18] sm:$0xff] %vm264_vm1, %v963_v7  ;;  %v306_v8 = vld [vmem:[#allocation2] sm:$0xff] }
  0x15   : > { %v392_v30 = vld [vmem:[#allocation2 + $0x8] sm:$0xff]  ;;  %274 = vst.msk [vmem:[#allocation4] sm:$0xff] %vm273_vm2, %v963_v7 }
  0x16   : > { %v487_v33 = vld [vmem:[#allocation2 + $0x10] sm:$0xff] }
  0x17   : > { %v1056_v34 = vld [vmem:[#allocation2 + $0x18] sm:$0xff] }
  0x18   : > { %458 = vrot.lane.b32.xlu2 %v278_v2, %s959_s23  ;;  %v322_v6 = vld [vmem:[#allocation3] sm:$0xff] }
  0x1c   : > { %v330_v55 = vld [vmem:[#allocation4] sm:$0xff] }
  0x20   : > { %552 = vrot.lane.b32.xlu2 %v278_v2, %s961_s25 }
  0x6a   : > { %v461_v14 = vpop.permute.xlu2 %460 }
  0x6b   : > { %866 = vmatpush.xpose.msk.msrb.mxu1 %vm279_vm0, %v461_v14 }
  0x72   : > { %v459_v18 = vpop.permute.xlu2 %458 }
  0x7a   : > { %v553_v22 = vpop.permute.xlu2 %552 }
  0x90   : > { %v303_v4 = vpop.f32.mrf.mxu0 }
  0x91   : > { %v307_v5 = vsel %vm279_vm0, %v303_v4, -inf }
  0x92   : > { %308 = vmax.xlane.f32.xlu0 %v307_v5 }
  0xa6   : > { %365 = vrot.lane.b32.xlu0 %v276_v0, %s960_s24 }
 0x105   : > { %v309_v9 = vpop.xlane.xlu0 %308 }
 0x106   : > { %v310_v10 = vmax.f32 %v306_v8, %v309_v9 }
 0x108   : > { %v311_v11 = vsub.f32 %v306_v8, %v310_v10  ;;  %362 = vst.msk [vmem:[#allocation2] sm:$0xff] %vm264_vm1, %v310_v10  ;;  %316 = vperm.xlu1 %907, %v310_v10  }
 0x10a   : > { %v312_v41 = vmul.f32 1.442695, %v311_v11 }
 0x110   : > { %363 = vrot.lane.b32.xlu1 %v278_v2, %s960_s24 }
 0x118   : > { %554 = vrot.lane.b32.xlu1 %v276_v0, %s961_s25  ;;  %v366_v12 = vpop.permute.xlu0 %365 }
 0x119   : > { %863 = vmatpush.xpose.msk.msra.mxu2 %vm279_vm0, %v366_v12 }
 0x17a   : > { %v317_v15 = vpop.permute.xlu1 %316 }
 0x17b   : > { %v319_v16 = vsub.f32 %v303_v4, %v317_v15 }
 0x17d   : > { %v320_v17 = vmul.f32 1.442695, %v319_v16 }
 0x17f   : > { %910 = vpow2.f32 %v320_v17 }
 0x180   : > { %912 = vpow2.f32 %v312_v41 }
 0x182   : > { %v364_v19 = vpop.permute.xlu1 %363 }
 0x183   : > { %864 = vmatmul.msk.f32.vlgmr.msra.gmra.mxu2 %vm279_vm0, %v364_v19 }
 0x185   : > { %v911_v20 = vpop.eup %910 }
 0x186   : > { %862 = vmatmul.msk.f32.vlgmr.msra.gmra.mxu1 %vm279_vm0, %v911_v20  ;;  %v913_v44 = vpop.eup %912  ;;  %v324_v46 = vsel %vm279_vm0, %v911_v20, 0.0 }
 0x187   : > { %v323_v7 = vmul.f32 %v913_v44, %v322_v6 }
 0x18a   : > { %v555_v21 = vpop.permute.xlu1 %554 }
 0x18b   : > { %869 = vmatpush.xpose.msk.msrb.mxu0 %vm279_vm0, %v555_v21  ;;  %v409_v21 = vld [vmem:[#allocation3 + $0x8] sm:$0xff] }
 0x18e   : > { %867 = vmatmul.msk.f32.vlgmr.msrb.gmra.mxu1 %vm279_vm0, %v459_v18  ;;  %870 = vmatmul.msk.f32.vlgmr.msrb.gmra.mxu0 %vm279_vm0, %v553_v22 }
 0x203   : > { %v357_v23 = vpop.f32.mrf.mxu1 }
 0x206   : > { %v388_v24 = vpop.f32.mrf.mxu2 }
 0x207   : > { %v393_v25 = vsel %vm279_vm0, %v388_v24, -inf }
 0x208   : > { %394 = vmax.xlane.f32.xlu1 %v393_v25 }
 0x20b   : > { %v1049_v26 = vpop.f32.mrf.mxu1  ;;  %v577_v27 = vpop.f32.mrf.mxu0 }
 0x20c   : > { %v488_v28 = vsel %vm279_vm0, %v1049_v26, -inf  ;;  %v582_v29 = vsel %vm279_vm0, %v577_v27, -inf }
 0x20d   : > { %489 = vmax.xlane.f32.xlu2 %v488_v28  ;;  %583 = vmax.xlane.f32.xlu0 %v582_v29  ;;  %v598_v28 = vld [vmem:[#allocation3 + $0x18] sm:$0xff] }
 0x221   : > { %424 = vrot.lane.b32.xlu1 %v277_v13, %s960_s24 }
 0x27b   : > { %v395_v31 = vpop.xlane.xlu1 %394 }
 0x27c   : > { %v396_v32 = vmax.f32 %v392_v30, %v395_v31 }
 0x27e   : > { %457 = vst.msk [vmem:[#allocation2 + $0x8] sm:$0xff] %vm264_vm1, %v396_v32  ;;  %402 = vperm.xlu2 %908, %v396_v32   ;;  %v397_v42 = vsub.f32 %v392_v30, %v396_v32 }
 0x280   : > { %v490_v35 = vpop.xlane.xlu2 %489  ;;  %v584_v36 = vpop.xlane.xlu0 %583  ;;  %v398_v43 = vmul.f32 1.442695, %v397_v42 }
 0x281   : > { %v491_v37 = vmax.f32 %v487_v33, %v490_v35  ;;  %v1059_v38 = vmax.f32 %v1056_v34, %v584_v36 }
 0x282   : > { %914 = vpow2.f32 %v398_v43 }
 0x283   : > { %v492_v39 = vsub.f32 %v487_v33, %v491_v37  ;;  %551 = vst.msk [vmem:[#allocation2 + $0x10] sm:$0xff] %vm264_vm1, %v491_v37  ;;  %v586_v40 = vsub.f32 %v1056_v34, %v1059_v38  ;;  %497 = vperm.xlu0 %909, %v491_v37   ;;  %591 = vperm.xlu1 %907, %v1059_v38  }
 0x284   : > { %645 = vst.msk [vmem:[#allocation2 + $0x18] sm:$0xff] %vm264_vm1, %v1059_v38 }
 0x285   : > { %v493_v4 = vmul.f32 1.442695, %v492_v39  ;;  %v587_v25 = vmul.f32 1.442695, %v586_v40 }
 0x286   : > { %518 = vrot.lane.b32.xlu2 %v277_v13, %s959_s23 }
 0x288   : > { %v1069_v45 = vpop.eup %914 }
 0x289   : > { %v410_v22 = vmul.f32 %v1069_v45, %v409_v21 }
 0x28e   : > { %612 = vrot.lane.b32.xlu2 %v277_v13, %s961_s25 }
 0x293   : > { %v425_v47 = vpop.permute.xlu1 %424 }
 0x294   : > { %445 = vmatpush.msra.mxu3 %v425_v47 }
 0x296   : > { %333 = vperm.xlu2 %908, %v913_v44  }
 0x29e   : > { %419 = vperm.xlu2 %908, %v1069_v45  }
 0x2ad   : > { %325 = vadd.xlane.f32.xlu1 %v324_v46 }
 0x2d8   : > { %v403_v48 = vpop.permute.xlu2 %402 }
 0x2d9   : > { %v405_v49 = vsub.f32 %v388_v24, %v403_v48 }
 0x2db   : > { %v406_v50 = vmul.f32 1.442695, %v405_v49 }
 0x2dd   : > { %916 = vpow2.f32 %v406_v50 }
 0x2e0   : > { %v519_v51 = vpop.permute.xlu2 %518 }
 0x2e1   : > { %539 = vmatpush.msrb.mxu3 %v519_v51 }
 0x2e3   : > { %v917_v52 = vpop.eup %916 }
 0x2e4   : > { %865 = vmatmul.msk.f32.vlgmr.msra.gmra.mxu3 %vm279_vm0, %v917_v52  ;;  %v411_v53 = vsel %vm279_vm0, %v917_v52, 0.0 }
 0x2e5   : > { %412 = vadd.xlane.f32.xlu0 %v411_v53 }
 0x2e8   : > { %v613_v54 = vpop.permute.xlu2 %612 }
 0x2e9   : > { %633 = vmatpush.msrb.mxu2 %v613_v54 }
 0x2f0   : > { %v334_v56 = vpop.permute.xlu2 %333 }
 0x2f1   : > { %v336_v57 = vmul.f32 %v334_v56, %v330_v55 }
 0x2f3   : > { %v360_v58 = vadd.f32 %v357_v23, %v336_v57 }
 0x2f5   : > { %361 = vst.msk [vmem:[#allocation4] sm:$0xff] %vm279_vm0, %v360_v58  ;;  %v592_v59 = vpop.permute.xlu1 %591  ;;  %v498_v60 = vpop.permute.xlu0 %497 }
 0x2f6   : > { %v594_v61 = vsub.f32 %v577_v27, %v592_v59  ;;  %v500_v62 = vsub.f32 %v1049_v26, %v498_v60 }
 0x2f8   : > { %v595_v63 = vmul.f32 1.442695, %v594_v61  ;;  %v501_v0 = vmul.f32 1.442695, %v500_v62  ;;  %v420_v57 = vpop.permute.xlu2 %419 }
 0x2fa   : > { %918 = vpow2.f32 %v595_v63 }
 0x2fb   : > { %920 = vpow2.f32 %v501_v0 }
 0x2fc   : > { %922 = vpow2.f32 %v493_v4  ;;  %v416_v58 = vld [vmem:[#allocation4] sm:$0xff] }
 0x2fd   : > { %v422_v59 = vmul.f32 %v420_v57, %v416_v58 }
 0x300   : > { %v919_v1 = vpop.eup %918 }
 0x301   : > { %v1079_v2 = vpop.eup %920  ;;  %871 = vmatmul.msk.f32.vlgmr.msrb.gmra.mxu2 %vm279_vm0, %v919_v1  ;;  %v600_v3 = vsel %vm279_vm0, %v919_v1, 0.0 }
 0x302   : > { %868 = vmatmul.msk.f32.vlgmr.msrb.gmra.mxu3 %vm279_vm0, %v1079_v2  ;;  %601 = vadd.xlane.f32.xlu1 %v600_v3  ;;  %v1085_v5 = vpop.eup %922  ;;  %v506_v45 = vsel %vm279_vm0, %v1079_v2, 0.0  ;;  %v504_v3 = vld [vmem:[#allocation3 + $0x10] sm:$0xff] }
 0x303   : > { %v505_v4 = vmul.f32 %v1085_v5, %v504_v3 }
 0x31b   : > { %514 = vperm.xlu1 %907, %v1085_v5  }
 0x320   : > { %v326_v8 = vpop.xlane.xlu1 %325 }
 0x321   : > { %v327_v9 = vadd.f32 %v326_v8, %v323_v7 }
 0x323   : > { %329 = vst.msk [vmem:[#allocation3] sm:$0xff] %vm264_vm1, %v327_v9 }
 0x32a   : > { %v649_v10 = vld [vmem:[#allocation3] sm:$0xff] }
 0x32b   : > { %924 = vrcp.f32 %v649_v10  ;;  %v661_v14 = vand.u32 2147483648, %v649_v10  ;;  %v659_v16 = vand.u32 2147483647, %v649_v10  ;;  %vm655_vm4 = vweird.f32 %v649_v10 }
 0x32c   : > { %926 = vpow2.f32 %v587_v25 }
 0x32d   : > { %v662_v18 = vor.u32 1.1754944e-38, %v661_v14  ;;  %vm660_vm6 = vcmp.eq.f32.partialorder %v659_v16, 8.507059e+37 }
 0x331   : > { %v925_v11 = vpop.eup %924 }
 0x332   : > { %v651_v12 = vmul.f32 %v925_v11, %v649_v10  ;;  %vm656_vm3 = vweird.f32 %v925_v11  ;;  %v927_v27 = vpop.eup %926 }
 0x333   : > { %vm657_vm5 = vmor %vm655_vm4, %vm656_vm3  ;;  %v599_v29 = vmul.f32 %v927_v27, %v598_v28  ;;  %vm549_vm3 = vcmask 195712   ;;  %vm643_vm4 = vcmask 261312  }
 0x334   : > { %v652_v13 = vsub.f32 1.0, %v651_v12 }
 0x336   : > { %v653_v15 = vmul.f32 %v925_v11, %v652_v13 }
 0x338   : > { %v654_v17 = vadd.f32 %v925_v11, %v653_v15 }
 0x33a   : > { %v658_v19 = vsel %vm657_vm5, %v925_v11, %v654_v17 }
 0x33b   : > { %v663_v20 = vsel %vm660_vm6, %v662_v18, %v658_v19 }
 0x33c   : > { %667 = vperm.xlu1 %907, %v663_v20  }
 0x358   : > { %v413_v23 = vpop.xlane.xlu0 %412 }
 0x359   : > { %v414_v24 = vadd.f32 %v413_v23, %v410_v22 }
 0x35b   : > { %415 = vst.msk [vmem:[#allocation3 + $0x8] sm:$0xff] %vm264_vm1, %v414_v24 }
 0x362   : > { %v672_v32 = vld [vmem:[#allocation3 + $0x8] sm:$0xff] }
 0x363   : > { %928 = vrcp.f32 %v672_v32  ;;  %v684_v44 = vand.u32 2147483648, %v672_v32  ;;  %vm678_vm8 = vweird.f32 %v672_v32  ;;  %v682_v46 = vand.u32 2147483647, %v672_v32 }
 0x365   : > { %v685_v49 = vor.u32 1.1754944e-38, %v684_v44  ;;  %vm683_vm10 = vcmp.eq.f32.partialorder %v682_v46, 8.507059e+37 }
 0x367   : > { %v447_v26 = vpop.f32.mrf.mxu3 }
 0x368   : > { %451 = vrot.lane.b32.xlu2 %v447_v26, %s964_s29 }
 0x369   : > { %v929_v33 = vpop.eup %928 }
 0x36a   : > { %v674_v36 = vmul.f32 %v929_v33, %v672_v32  ;;  %vm679_vm7 = vweird.f32 %v929_v33 }
 0x36b   : > { %vm680_vm9 = vmor %vm678_vm8, %vm679_vm7 }
 0x36c   : > { %v675_v34 = vsub.f32 1.0, %v674_v36 }
 0x36e   : > { %v676_v39 = vmul.f32 %v929_v33, %v675_v34 }
 0x370   : > { %v677_v42 = vadd.f32 %v929_v33, %v676_v39 }
 0x372   : > { %v681_v47 = vsel %vm680_vm9, %v929_v33, %v677_v42 }
 0x373   : > { %v686_v50 = vsel %vm683_vm10, %v685_v49, %v681_v47 }
 0x375   : > { %v602_v30 = vpop.xlane.xlu1 %601 }
 0x376   : > { %v603_v31 = vadd.f32 %v602_v30, %v599_v29 }
 0x378   : > { %604 = vst.msk [vmem:[#allocation3 + $0x18] sm:$0xff] %vm264_vm1, %v603_v31 }
 0x37f   : > { %v718_v35 = vld [vmem:[#allocation3 + $0x18] sm:$0xff] }
 0x380   : > { %930 = vrcp.f32 %v718_v35  ;;  %v730_v52 = vand.u32 2147483648, %v718_v35  ;;  %vm724_vm12 = vweird.f32 %v718_v35  ;;  %v728_v53 = vand.u32 2147483647, %v718_v35 }
 0x382   : > { %v731_v55 = vor.u32 1.1754944e-38, %v730_v52  ;;  %vm729_vm14 = vcmp.eq.f32.partialorder %v728_v53, 8.507059e+37 }
 0x384   : > { %v635_v41 = vpop.f32.mrf.mxu2 }
 0x385   : > { %v541_v37 = vpop.f32.mrf.mxu3 }
 0x386   : > { %545 = vrot.lane.b32.xlu0 %v541_v37, %s965_s30  ;;  %v931_v38 = vpop.eup %930 }
 0x387   : > { %v720_v40 = vmul.f32 %v931_v38, %v718_v35  ;;  %vm725_vm11 = vweird.f32 %v931_v38 }
 0x388   : > { %vm726_vm13 = vmor %vm724_vm12, %vm725_vm11 }
 0x389   : > { %v721_v43 = vsub.f32 1.0, %v720_v40 }
 0x38b   : > { %v722_v48 = vmul.f32 %v931_v38, %v721_v43 }
 0x38d   : > { %v723_v51 = vadd.f32 %v931_v38, %v722_v48  ;;  %v515_v63 = vpop.permute.xlu1 %514 }
 0x38e   : > { %639 = vrot.lane.b32.xlu0 %v635_v41, %s966_s4 }
 0x38f   : > { %v727_v54 = vsel %vm726_vm13, %v931_v38, %v723_v51 }
 0x390   : > { %v732_v56 = vsel %vm729_vm14, %v731_v55, %v727_v54 }
 0x391   : > { %507 = vadd.xlane.f32.xlu2 %v506_v45 }
 0x396   : > { %690 = vperm.xlu0 %909, %v686_v50  }
 0x39e   : > { %736 = vperm.xlu0 %909, %v732_v56  }
 0x3a9   : > { %608 = vperm.xlu2 %908, %v927_v27  }
 0x3ae   : > { %v668_v16 = vpop.permute.xlu1 %667 }
 0x3c2   : > { %v452_v60 = vpop.permute.xlu2 %451 }
 0x3c3   : > { %v454_v61 = vadd.f32 %v452_v60, %v422_v59 }
 0x3c5   : > { %456 = vst.msk [vmem:[#allocation4] sm:$0xff] %vm455_vm15, %v454_v61 }
 0x3cc   : > { %v511_v62 = vld [vmem:[#allocation4] sm:$0xff] }
 0x3cd   : > { %v517_v0 = vmul.f32 %v515_v63, %v511_v62 }
 0x3f8   : > { %v546_v1 = vpop.permute.xlu0 %545 }
 0x3f9   : > { %v548_v2 = vadd.f32 %v546_v1, %v517_v0 }
 0x3fb   : > { %550 = vst.msk [vmem:[#allocation4] sm:$0xff] %vm549_vm3, %v548_v2 }
 0x400   : > { %v640_v11 = vpop.permute.xlu0 %639 }
 0x402   : > { %v605_v9 = vld [vmem:[#allocation4] sm:$0xff] }
 0x404   : > { %v508_v6 = vpop.xlane.xlu2 %507 }
 0x405   : > { %v509_v7 = vadd.f32 %v508_v6, %v505_v4 }
 0x407   : > { %510 = vst.msk [vmem:[#allocation3 + $0x10] sm:$0xff] %vm264_vm1, %v509_v7 }
 0x408   : > { %v691_v26 = vpop.permute.xlu0 %690 }
 0x40c   : > { %v609_v8 = vpop.permute.xlu2 %608 }
 0x40d   : > { %v611_v10 = vmul.f32 %v609_v8, %v605_v9 }
 0x40e   : > { %v695_v12 = vld [vmem:[#allocation3 + $0x10] sm:$0xff] }
 0x40f   : > { %v642_v13 = vadd.f32 %v640_v11, %v611_v10  ;;  %932 = vrcp.f32 %v695_v12  ;;  %v707_v19 = vand.u32 2147483648, %v695_v12  ;;  %v705_v21 = vand.u32 2147483647, %v695_v12 }
 0x410   : > { %vm701_vm1 = vweird.f32 %v695_v12  ;;  %v737_v32 = vpop.permute.xlu0 %736 }
 0x411   : > { %644 = vst.msk [vmem:[#allocation4] sm:$0xff] %vm643_vm4, %v642_v13  ;;  %v708_v23 = vor.u32 1.1754944e-38, %v707_v19  ;;  %vm706_vm7 = vcmp.eq.f32.partialorder %v705_v21, 8.507059e+37 }
 0x415   : > { %v933_v14 = vpop.eup %932 }
 0x416   : > { %v697_v15 = vmul.f32 %v933_v14, %v695_v12  ;;  %vm702_vm5 = vweird.f32 %v933_v14 }
 0x417   : > { %vm703_vm6 = vmor %vm701_vm1, %vm702_vm5 }
 0x418   : > { %v664_v17 = vld [vmem:[#allocation4] sm:$0xff]  ;;  %v698_v18 = vsub.f32 1.0, %v697_v15 }
 0x419   : > { %v670_v5 = vmul.f32 %v668_v16, %v664_v17 }
 0x41a   : > { %v699_v20 = vmul.f32 %v933_v14, %v698_v18 }
 0x41b   : > { %671 = vst.msk [vmem:[#allocation4] sm:$0xff] %vm279_vm0, %v670_v5 }
 0x41c   : > { %v700_v22 = vadd.f32 %v933_v14, %v699_v20 }
 0x41e   : > { %v704_v24 = vsel %vm703_vm6, %v933_v14, %v700_v22 }
 0x41f   : > { %v709_v25 = vsel %vm706_vm7, %v708_v23, %v704_v24 }
 0x420   : > { %713 = vperm.xlu1 %907, %v709_v25  }
 0x422   : > { %v687_v27 = vld [vmem:[#allocation4] sm:$0xff] }
 0x423   : > { %v693_v28 = vmul.f32 %v691_v26, %v687_v27 }
 0x425   : > { %694 = vst.msk [vmem:[#allocation4] sm:$0xff] %vm455_vm15, %v693_v28 }
 0x42c   : > { %v710_v30 = vld [vmem:[#allocation4] sm:$0xff] }
 0x492   : > { %v714_v29 = vpop.permute.xlu1 %713 }
 0x493   : > { %v716_v31 = vmul.f32 %v714_v29, %v710_v30 }
 0x495   : > { %717 = vst.msk [vmem:[#allocation4] sm:$0xff] %vm549_vm3, %v716_v31 }
 0x49c   : > { %v733_v33 = vld [vmem:[#allocation4] sm:$0xff] }
 0x49d   : > { %v739_v35 = vmul.f32 %v737_v32, %v733_v33 }
 0x49f   : > { %740 = vst.msk [vmem:[#allocation4] sm:$0xff] %vm643_vm4, %v739_v35 }
 0x4a6   : > { %v741_v36 = vld [vmem:[#allocation4] sm:$0xff] }
 0x4a7   : > { %743 = vst.msk [vmem:[%s259_s7] sm:$0xff] %vm273_vm2, %v741_v36 }
 0x4a8 PF: > { %s13_s14 = sadd.s32 1, %s956_s14   ;;  %s1124_s12 = smov %s952_s13 }
 0x4a9   : > { %p10_p5 = scmp.ge.s32.totalorder %s13_s14, 4   ;;  %s1125_s13 = smov %s1127_s15 }
 0x4ab   :  { %12 = sbr.rel (!%p10_p5) target bundleno = 2 (0x2), region = 82 }

</bundles_post_ra>
